<compile_context>
chip_gen: v5e
topology: v5e:2x2
jax: 0.10.0
libtpu: 0.0.40
codegen_flags: <defaults>
</compile_context>

<pallas_src>
import functools
import math

import jax
import jax.numpy as jnp
from jax.experimental import pallas as pl
from jax.experimental.pallas import tpu as pltpu


def _round_up(v, m):
    return ((v + m - 1) // m) * m


def _cdiv(a, b):
    return -(-a // b)


def _pair(v):
    return (v, v) if isinstance(v, int) else tuple(v)


# ----------------------------------------------------------------------------
# Pallas kernel: one (phase, row-tile) step = one MXU matmul + bias + ReLU.
# ----------------------------------------------------------------------------
def _deconv_kernel(x_ref, w_ref, b_ref, o_ref):
    """x_ref: (1, bm, K)  bf16  folded-tap LHS rows for this phase/row tile
       w_ref: (1, K, Cp)  bf16  folded-tap weights for this phase
       b_ref: (1, Cp)     f32   bias (zero in padded lanes)
       o_ref: (1, bm, Cp) f32   output rows
    """
    acc = jnp.dot(x_ref[0], w_ref[0], preferred_element_type=jnp.float32)
    o_ref[0] = jnp.maximum(acc + b_ref[...], 0.0)


# ----------------------------------------------------------------------------
# Wrapper: phase geometry, tap folding, single fused pallas_call, interleave.
# ----------------------------------------------------------------------------
def deconv2d_relu(x_nchw, w, b, stride, padding):
    """relu(ConvTranspose2d(x)).  x: (N,Cin,H,W); w: (Cin,Cout,Kh,Kw); b: (Cout,)."""
    sh, sw = _pair(stride)
    ph, pw = _pair(padding)
    n, cin, h, wdt = x_nchw.shape
    _, cout, kh, kw = w.shape
    ho = (h - 1) * sh - 2 * ph + kh
    wo = (wdt - 1) * sw - 2 * pw + kw
    cp = _round_up(cout, 128)                  # lane-dense output slab

    # Phase p = (omh, omw) covers outputs with oh % sh == omh, ow % sw == omw.
    # It is fed by kernel taps k = r + m*s (r = (om + pad) % s) reading input
    # q = q0 + i - m for local output index i.
    lh, lw = _cdiv(ho, sh), _cdiv(wo, sw)      # (padded) per-phase output extent
    mh, mw = _cdiv(kh, sh), _cdiv(kw, sw)      # max taps per phase along h / w

    def phase(om, s, pad):
        r = (om + pad) % s
        q0 = (om + pad - r) // s
        return r, q0

    gh = [phase(om, sh, ph) for om in range(sh)]
    gw = [phase(om, sw, pw) for om in range(sw)]

    # Global zero padding of the input covering every (phase, tap) window.
    lpad_h = max([0] + [(mh - 1) - q0 for _, q0 in gh])
    rpad_h = max([0] + [q0 + lh - h for _, q0 in gh])
    lpad_w = max([0] + [(mw - 1) - q0 for _, q0 in gw])
    rpad_w = max([0] + [q0 + lw - wdt for _, q0 in gw])

    # bf16 NHWC activations: half the DMA bytes, no per-tap casts in-kernel.
    xb = jnp.transpose(x_nchw, (0, 2, 3, 1)).astype(jnp.bfloat16)
    xpad = jnp.pad(xb, ((0, 0), (lpad_h, rpad_h), (lpad_w, rpad_w), (0, 0)))

    t = mh * mw
    k_dim = t * cin
    m_rows = lh * lw
    nphase = sh * sw

    # Fold all taps of each phase into the contraction dimension.
    # Invalid taps (stride > kernel reach for this residue) get zero weights, so
    # the same matmul also covers bias-only phases with no special casing.
    # TODO(synk): for very large feature maps, replace this wrapper-side gather
    # (im2col-like, ~Kh*Kw x input HBM bytes) with an in-kernel single-view tap
    # walk to keep input HBM traffic at 1x.
    lhs_phases, w_phases = [], []
    wz = jnp.zeros((cin, cout), w.dtype)
    for rh, q0h in gh:
        for rw, q0w in gw:
            taps_x, taps_w = [], []
            for m in range(mh):
                for nn in range(mw):
                    r0 = lpad_h + q0h - m
                    c0 = lpad_w + q0w - nn
                    taps_x.append(xpad[:, r0:r0 + lh, c0:c0 + lw, :])
                    khi, kwi = rh + m * sh, rw + nn * sw
                    taps_w.append(w[:, :, khi, kwi]
                                  if (khi < kh and kwi < kw) else wz)
            lx = jnp.stack(taps_x, axis=3)                 # (N, lh, lw, T, Cin)
            lhs_phases.append(lx.reshape(n, m_rows, k_dim))
            w_phases.append(jnp.concatenate(taps_w, axis=0))  # (T*Cin, Cout)

    # Merge batch into the row axis and tile rows (multiples of 16, up to 512).
    m_pad = _round_up(m_rows, 16)
    lhs = jnp.stack(lhs_phases, axis=0)                    # (P, N, M, K) bf16
    lhs = jnp.pad(lhs, ((0, 0), (0, 0), (0, m_pad - m_rows), (0, 0)))
    rows = n * m_pad
    bm = rows if rows <= 512 else 512
    rows_pad = _round_up(rows, bm)
    lhs = lhs.reshape(nphase, rows, k_dim)
    lhs = jnp.pad(lhs, ((0, 0), (0, rows_pad - rows), (0, 0)))
    grid_m = rows_pad // bm

    wstack = jnp.stack(w_phases, axis=0)                   # (P, K, Cout)
    wstack = jnp.pad(wstack, ((0, 0), (0, 0), (0, cp - cout)))
    wstack = wstack.astype(jnp.bfloat16)
    bias = jnp.zeros((1, cp), jnp.float32).at[0, :cout].set(
        b.astype(jnp.float32))

    # Keep well inside v7x's 64 MiB physical VMEM (blocks are double-buffered).
    block_bytes = 2 * (bm * k_dim * 2 + k_dim * cp * 2 + bm * cp * 4) + cp * 4
    vmem_limit = int(min(60 << 20, max(32 << 20, 4 * block_bytes)))

    out = pl.pallas_call(
        _deconv_kernel,
        out_shape=jax.ShapeDtypeStruct((nphase, rows_pad, cp), jnp.float32),
        grid=(nphase, grid_m),
        in_specs=[
            pl.BlockSpec((1, bm, k_dim), lambda p, i: (p, i, 0)),
            pl.BlockSpec((1, k_dim, cp), lambda p, i: (p, 0, 0)),
            pl.BlockSpec((1, cp), lambda p, i: (0, 0)),
        ],
        out_specs=pl.BlockSpec((1, bm, cp), lambda p, i: (p, i, 0)),
        compiler_params=pltpu.CompilerParams(
            dimension_semantics=("parallel", "parallel"),
            vmem_limit_bytes=vmem_limit),
    )(lhs, wstack, bias)

    # Single-pass interleave of the sh*sw phases into the full output
    # (replaces per-phase strided scatters + zero init); :cout sliced once.
    # Garbage rows from length/row padding land at oh >= ho / ow >= wo and are
    # removed by the final slice.
    # TODO(synk): pack sw phases' channels into one lane-dense slab to cut the
    # Cout->128 padding writeback further.
    y = out[:, :rows, :].reshape(nphase, n, m_pad, cp)[:, :, :m_rows, :cout]
    y = y.reshape(sh, sw, n, lh, lw, cout)
    y = jnp.transpose(y, (2, 3, 0, 4, 1, 5)).reshape(n, lh * sh, lw * sw, cout)
    y = y[:, :ho, :wo, :]
    return jnp.transpose(y, (0, 3, 1, 2))                  # back to NCHW


# ----------------------------------------------------------------------------
# Plain-JAX reference (dilate + flipped-kernel conv) for self-validation.
# ----------------------------------------------------------------------------
def _deconv_relu_reference(x, w, b, stride, padding):
    sh, sw = _pair(stride)
    ph, pw = _pair(padding)
    _, cout, kh, kw = w.shape
    wf = jnp.transpose(w, (1, 0, 2, 3))[:, :, ::-1, ::-1]  # (Cout,Cin,Kh,Kw)
    y = jax.lax.conv_general_dilated(
        x, wf, window_strides=(1, 1),
        padding=[(kh - 1 - ph, kh - 1 - ph), (kw - 1 - pw, kw - 1 - pw)],
        lhs_dilation=(sh, sw),
        dimension_numbers=("NCHW", "OIHW", "NCHW"),
        precision=jax.lax.Precision.HIGHEST)
    return jnp.maximum(y + b.reshape(1, cout, 1, 1), 0.0)


# ----------------------------------------------------------------------------
if __name__ == "__main__":
    key = jax.random.PRNGKey(0)
    kx, kwa, kba, kwb, kbb = jax.random.split(key, 5)

    # Small shapes consistent with SqueezeSeg's use of Deconv.
    N, CIN, H, W = 2, 32, 8, 16
    x = jax.random.normal(kx, (N, CIN, H, W), jnp.float32)

    # Config A: Deconv(32, 32, kernel_size=(1,4), stride=(1,2), padding=(0,1))
    COUT_A, K_A, S_A, P_A = 32, (1, 4), (1, 2), (0, 1)
    w_a = jax.random.normal(kwa, (CIN, COUT_A) + K_A, jnp.float32) \
        / math.sqrt(CIN * K_A[0] * K_A[1])
    b_a = 0.1 * jax.random.normal(kba, (COUT_A,), jnp.float32)
    fwd_a = jax.jit(functools.partial(deconv2d_relu, stride=S_A, padding=P_A))
    out_a = jax.block_until_ready(fwd_a(x, w_a, b_a))
    assert out_a.shape == (N, COUT_A, H, 2 * W), out_a.shape
    ref_a = _deconv_relu_reference(x, w_a, b_a, S_A, P_A)
    err_a = float(jnp.max(jnp.abs(out_a - ref_a)))
    assert err_a < 5e-2, err_a

    # Config B: Deconv(32, 48, kernel_size=4, stride=2, padding=1)
    COUT_B, K_B, S_B, P_B = 48, (4, 4), (2, 2), (1, 1)
    w_b = jax.random.normal(kwb, (CIN, COUT_B) + K_B, jnp.float32) \
        / math.sqrt(CIN * K_B[0] * K_B[1])
    b_b = 0.1 * jax.random.normal(kbb, (COUT_B,), jnp.float32)
    fwd_b = jax.jit(functools.partial(deconv2d_relu, stride=S_B, padding=P_B))
    out_b = jax.block_until_ready(fwd_b(x, w_b, b_b))
    assert out_b.shape == (N, COUT_B, 2 * H, 2 * W), out_b.shape
    ref_b = _deconv_relu_reference(x, w_b, b_b, S_B, P_B)
    err_b = float(jnp.max(jnp.abs(out_b - ref_b)))
    assert err_b < 5e-2, err_b

    assert bool(jnp.all(jnp.isfinite(out_a))) and bool(jnp.all(jnp.isfinite(out_b)))
    print("KERNEL_OK")
</pallas_src>

<mosaic_0001>
module attributes {stable_mosaic.version = 11 : i64} {
  func.func @_deconv_kernel(%arg0: i32, %arg1: i32, %arg2: memref<1x256x64xbf16, #tpu.memory_space<vmem>>, %arg3: memref<1x64x128xbf16, #tpu.memory_space<vmem>>, %arg4: memref<1x128xf32, #tpu.memory_space<vmem>>, %arg5: memref<1x256x128xf32, #tpu.memory_space<vmem>>) attributes {dimension_semantics = [#tpu.dimension_semantics<parallel>, #tpu.dimension_semantics<parallel>], iteration_bounds = array<i64: 2, 1>, scalar_prefetch = 0 : i64, scratch_operands = 0 : i64, tpu.core_type = #tpu.core_type<tc>, window_params = [{transform_indices = @transform_0, window_bounds = array<i64: 1, 256, 64>}, {transform_indices = @transform_1, window_bounds = array<i64: 1, 64, 128>}, {pipeline_mode = #tpu.pipeline_mode<synchronous>, transform_indices = @transform_2, window_bounds = array<i64: 1, 128>}, {transform_indices = @transform_3, window_bounds = array<i64: 1, 256, 128>}]} {
    %c0 = arith.constant 0 : index
    %c0_0 = arith.constant 0 : index
    %c0_1 = arith.constant 0 : index
    %0 = vector.load %arg2[%c0, %c0_0, %c0_1] : memref<1x256x64xbf16, #tpu.memory_space<vmem>>, vector<1x256x64xbf16>
    %1 = vector.shape_cast %0 : vector<1x256x64xbf16> to vector<256x64xbf16>
    %c0_2 = arith.constant 0 : index
    %c0_3 = arith.constant 0 : index
    %c0_4 = arith.constant 0 : index
    %2 = vector.load %arg3[%c0_2, %c0_3, %c0_4] : memref<1x64x128xbf16, #tpu.memory_space<vmem>>, vector<1x64x128xbf16>
    %3 = vector.shape_cast %2 : vector<1x64x128xbf16> to vector<64x128xbf16>
    %cst = arith.constant dense<0.000000e+00> : vector<256x128xf32>
    %4 = tpu.matmul %1, %3, %cst {dimension_numbers = #tpu.dot_dimension_numbers<[1], [0], [0], [1], [0, 0, 1, 1], [], []>} : vector<256x64xbf16>, vector<64x128xbf16>, vector<256x128xf32> -> vector<256x128xf32>
    %c0_5 = arith.constant 0 : index
    %c0_6 = arith.constant 0 : index
    %5 = vector.load %arg4[%c0_5, %c0_6] : memref<1x128xf32, #tpu.memory_space<vmem>>, vector<1x128xf32>
    %6 = vector.broadcast %5 : vector<1x128xf32> to vector<256x128xf32>
    %7 = arith.addf %4, %6 : vector<256x128xf32>
    %cst_7 = arith.constant 0.000000e+00 : f32
    %8 = vector.broadcast %cst_7 : f32 to vector<256x128xf32>
    %9 = arith.maximumf %7, %8 : vector<256x128xf32>
    %c0_8 = arith.constant 0 : index
    %c0_9 = arith.constant 0 : index
    %c0_10 = arith.constant 0 : index
    %10 = vector.load %arg5[%c0_8, %c0_9, %c0_10] : memref<1x256x128xf32, #tpu.memory_space<vmem>>, vector<1x256x128xf32>
    %11 = vector.shape_cast %10 : vector<1x256x128xf32> to vector<256x128xf32>
    %12 = vector.shape_cast %9 : vector<256x128xf32> to vector<1x256x128xf32>
    tpu.vector_store %arg5[%c0_8, %c0_9, %c0_10], %12 {strides = array<i32>} : memref<1x256x128xf32, #tpu.memory_space<vmem>>, vector<1x256x128xf32>,
    return
  }
  func.func @transform_0(%arg0: i32, %arg1: i32) -> (i32, i32, i32) {
    %c0_i32 = arith.constant 0 : i32
    %c0_i32_0 = arith.constant 0 : i32
    return %arg0, %arg1, %c0_i32 : i32, i32, i32
  }
  func.func @transform_1(%arg0: i32, %arg1: i32) -> (i32, i32, i32) {
    %c0_i32 = arith.constant 0 : i32
    %c0_i32_0 = arith.constant 0 : i32
    %c0_i32_1 = arith.constant 0 : i32
    return %arg0, %c0_i32, %c0_i32_0 : i32, i32, i32
  }
  func.func @transform_2(%arg0: i32, %arg1: i32) -> (i32, i32) {
    %c0_i32 = arith.constant 0 : i32
    %c0_i32_0 = arith.constant 0 : i32
    %c0_i32_1 = arith.constant 0 : i32
    return %c0_i32, %c0_i32_0 : i32, i32
  }
  func.func @transform_3(%arg0: i32, %arg1: i32) -> (i32, i32, i32) {
    %c0_i32 = arith.constant 0 : i32
    %c0_i32_0 = arith.constant 0 : i32
    return %arg0, %arg1, %c0_i32 : i32, i32, i32
  }
}

</mosaic_0001>

<bundles_post_ra>
// kernel: deconv2d_relu.1
= control target key start
LH: loop header
LB: loop body
LE: loop exit
PB: predicated region body
PF: predicated region fallthrough
CT: control target
= control target key end

     0   :  { %s893_s12 = smov 0   ;;  %s895_s13 = smov 0   ;;  %s1039_s0 = inlined_call_operand.vmem [shape: bf16[2,256,64], index: 0, kind: input, shape index: {}]   ;;  %s1040_s1 = inlined_call_operand.vmem [shape: bf16[2,64,128], index: 1, kind: input, shape index: {}]   ;;  %s1041_s2 = inlined_call_operand.vmem [shape: f32[1,128], index: 2, kind: input, shape index: {}]   ;;  %s1042_s3 = inlined_call_operand.vmem [shape: f32[2,256,128], index: 3, kind: output, shape index: {}]  }
   0x1   :  { %s897_s14 = smov 0  }
   0x2 LB: > { %s25_s15 = sadd.s32 1, %s867_s13  ;;  %p684_p0 = scmp.ge.s32.totalorder %s871_s14, 1  ;;  %s871_s14 = sphi %s897_s14, %s13_s14   ;;  %s867_s13 = sphi %s895_s13, %s1044_s13   ;;  %s863_s12 = sphi %s893_s12, %s1043_s12  }
   0x3   : > { %p27_p1 = scmp.ge.s32.totalorder %s25_s15, 2  ;;  %p168_p2 = scmp.lt.s32.totalorder %s871_s14, 3 }
   0x5   : > { %s1046_s15 = smov (%p27_p1, %s25_s15), 0  ;;  %p169_p3 = pnand %p684_p0, %p168_p2 }
   0x6   : > { %p206_p4 = scmp.lt.s32.totalorder (!%p169_p3), %s863_s12, 1 }
   0x7   : > { %172 = sbr.rel (%p169_p3) target bundleno = 226 (0xe2), region = 32 }
   0xc   : > { %s1048_s12 = smov (!%p206_p4, %s863_s12), 1  ;;  %vm379_vm0 = vcmask 523264   ;;  %v958_v20 = vld [vmem:[%s1041_s2] ss:$0 sm:$0xff] }
   0xd   : > { %s790_s16 = sshll.u32 %s1048_s12, 5  ;;  %s789_s20 = sshll.u32 %s1048_s12, 7 }
   0xe   : > { %s219_s19 = scalar_lea.vmem %s1040_s1, %s790_s16  ;;  %s921_s23 = scalar_lea.vmem %s1039_s0, %s789_s20 }
   0xf   : > { %v811_v0 = vld [vmem:[%s219_s19 + $0x18] sm:$0xff]  ;;  %v810_v1 = vld [vmem:[%s219_s19 + $0x10] sm:$0xff]  ;;  %v809_v2 = vld [vmem:[%s219_s19 + $0x8] sm:$0xff]  ;;  %s791_s26 = sshll.u32 %s1048_s12, 8 }
  0x10   : > { %432 = vmatpush.bf16.msra.mxu0 %v811_v0  ;;  %812 = vmatpush.bf16.msra.mxu1 %v811_v0  ;;  %v808_v3 = vld [vmem:[%s219_s19] sm:$0xff]  ;;  %v793_v8 = vld [vmem:[%s921_s23 + $0x8] sm:$0xff]  ;;  %v794_v12 = vld [vmem:[%s921_s23 + $0x10] sm:$0xff]  ;;  %s966_s29 = scalar_lea.vmem %s1042_s3, %s791_s26 }
  0x11   : > { %813 = vmatpush.bf16.msra.mxu2 %v811_v0  ;;  %814 = vmatpush.bf16.msra.mxu3 %v811_v0  ;;  %v792_v4 = vld [vmem:[%s921_s23] sm:$0xff]  ;;  %v797_v9 = vld [vmem:[%s921_s23 + $0x28] sm:$0xff]  ;;  %v798_v13 = vld [vmem:[%s921_s23 + $0x30] sm:$0xff] }
  0x12   : > { %v796_v5 = vld [vmem:[%s921_s23 + $0x20] sm:$0xff]  ;;  %v801_v10 = vld [vmem:[%s921_s23 + $0x48] sm:$0xff]  ;;  %v802_v14 = vld [vmem:[%s921_s23 + $0x50] sm:$0xff] }
  0x13   : > { %v800_v6 = vld [vmem:[%s921_s23 + $0x40] sm:$0xff]  ;;  %v805_v11 = vld [vmem:[%s921_s23 + $0x68] sm:$0xff]  ;;  %v806_v15 = vld [vmem:[%s921_s23 + $0x70] sm:$0xff] }
  0x14   : > { %433 = vmatpush.bf16.msra.mxu0 %v810_v1  ;;  %815 = vmatpush.bf16.msra.mxu1 %v810_v1  ;;  %v804_v7 = vld [vmem:[%s921_s23 + $0x60] sm:$0xff]  ;;  %v795_v16 = vld [vmem:[%s921_s23 + $0x18] sm:$0xff] }
  0x15   : > { %816 = vmatpush.bf16.msra.mxu2 %v810_v1  ;;  %817 = vmatpush.bf16.msra.mxu3 %v810_v1  ;;  %v799_v17 = vld [vmem:[%s921_s23 + $0x38] sm:$0xff] }
  0x16   : > { %v803_v18 = vld [vmem:[%s921_s23 + $0x58] sm:$0xff] }
  0x17   : > { %v807_v19 = vld [vmem:[%s921_s23 + $0x78] sm:$0xff] }
  0x18   : > { %434 = vmatpush.bf16.msra.mxu0 %v809_v2  ;;  %818 = vmatpush.bf16.msra.mxu1 %v809_v2 }
  0x19   : > { %819 = vmatpush.bf16.msra.mxu2 %v809_v2  ;;  %820 = vmatpush.bf16.msra.mxu3 %v809_v2 }
  0x1c   : > { %435 = vmatpush.bf16.msra.mxu0 %v808_v3  ;;  %821 = vmatpush.bf16.msra.mxu1 %v808_v3 }
  0x1d   : > { %822 = vmatpush.bf16.msra.mxu2 %v808_v3  ;;  %823 = vmatpush.bf16.msra.mxu3 %v808_v3 }
  0x1f   : > { %771 = vmatmul.msk.bf16.vlgmr.msra.gmra.mxu0 %vm379_vm0, %v792_v4  ;;  %775 = vmatmul.msk.bf16.vlgmr.msra.gmra.mxu1 %vm379_vm0, %v796_v5 }
  0x20   : > { %779 = vmatmul.msk.bf16.vlgmr.msra.gmra.mxu2 %vm379_vm0, %v800_v6  ;;  %783 = vmatmul.msk.bf16.vlgmr.msra.gmra.mxu3 %vm379_vm0, %v804_v7 }
  0x2f   : > { %772 = vmatmul.msk.bf16.gmra.mxu0 %vm379_vm0, %v793_v8  ;;  %776 = vmatmul.msk.bf16.gmra.mxu1 %vm379_vm0, %v797_v9 }
  0x30   : > { %780 = vmatmul.msk.bf16.gmra.mxu2 %vm379_vm0, %v801_v10  ;;  %784 = vmatmul.msk.bf16.gmra.mxu3 %vm379_vm0, %v805_v11 }
  0x3f   : > { %773 = vmatmul.msk.bf16.gmra.mxu0 %vm379_vm0, %v794_v12  ;;  %777 = vmatmul.msk.bf16.gmra.mxu1 %vm379_vm0, %v798_v13 }
  0x40   : > { %781 = vmatmul.msk.bf16.gmra.mxu2 %vm379_vm0, %v802_v14  ;;  %785 = vmatmul.msk.bf16.gmra.mxu3 %vm379_vm0, %v806_v15 }
  0x4f   : > { %774 = vmatmul.msk.bf16.gmra.mxu0 %vm379_vm0, %v795_v16  ;;  %778 = vmatmul.msk.bf16.gmra.mxu1 %vm379_vm0, %v799_v17 }
  0x50   : > { %782 = vmatmul.msk.bf16.gmra.mxu2 %vm379_vm0, %v803_v18  ;;  %786 = vmatmul.msk.bf16.gmra.mxu3 %vm379_vm0, %v807_v19 }
  0x9c   : > { %v437_v21 = vpop.f32.mrf.mxu0  ;;  %v457_v22 = vpop.f32.mrf.mxu1 }
  0x9d   : > { %v438_v23 = vadd.f32 %v958_v20, %v437_v21  ;;  %v458_v24 = vadd.f32 %v958_v20, %v457_v22 }
  0x9f   : > { %v517_v25 = vmax.f32 %v438_v23, 0.0  ;;  %v525_v26 = vmax.f32 %v458_v24, 0.0 }
  0xa1   : > { %549 = vst [vmem:[%s966_s29] sm:$0xff] %v517_v25 }
  0xa2   : > { %557 = vst [vmem:[%s966_s29 + $0x40] sm:$0xff] %v525_v26 }
  0xa3   : > { %v477_v27 = vpop.f32.mrf.mxu2  ;;  %v497_v28 = vpop.f32.mrf.mxu3 }
  0xa4   : > { %v478_v29 = vadd.f32 %v958_v20, %v477_v27  ;;  %v498_v30 = vadd.f32 %v958_v20, %v497_v28  ;;  %v439_v31 = vpop.f32.mrf.mxu0  ;;  %v459_v32 = vpop.f32.mrf.mxu1 }
  0xa5   : > { %v440_v33 = vadd.f32 %v958_v20, %v439_v31  ;;  %v460_v34 = vadd.f32 %v958_v20, %v459_v32 }
  0xa6   : > { %v533_v35 = vmax.f32 %v478_v29, 0.0  ;;  %v541_v36 = vmax.f32 %v498_v30, 0.0 }
  0xa7   : > { %v518_v37 = vmax.f32 %v440_v33, 0.0  ;;  %v526_v38 = vmax.f32 %v460_v34, 0.0 }
  0xa8   : > { %565 = vst [vmem:[%s966_s29 + $0x80] sm:$0xff] %v533_v35 }
  0xa9   : > { %573 = vst [vmem:[%s966_s29 + $0xc0] sm:$0xff] %v541_v36 }
  0xaa   : > { %550 = vst [vmem:[%s966_s29 + $0x8] sm:$0xff] %v518_v37 }
  0xab   : > { %558 = vst [vmem:[%s966_s29 + $0x48] sm:$0xff] %v526_v38  ;;  %v479_v39 = vpop.f32.mrf.mxu2  ;;  %v499_v40 = vpop.f32.mrf.mxu3 }
  0xac   : > { %v480_v41 = vadd.f32 %v958_v20, %v479_v39  ;;  %v500_v42 = vadd.f32 %v958_v20, %v499_v40  ;;  %v442_v43 = vpop.f32.mrf.mxu0  ;;  %v462_v44 = vpop.f32.mrf.mxu1 }
  0xad   : > { %v443_v45 = vadd.f32 %v958_v20, %v442_v43  ;;  %v463_v46 = vadd.f32 %v958_v20, %v462_v44 }
  0xae   : > { %v534_v47 = vmax.f32 %v480_v41, 0.0  ;;  %v542_v48 = vmax.f32 %v500_v42, 0.0 }
  0xaf   : > { %v519_v49 = vmax.f32 %v443_v45, 0.0  ;;  %v527_v50 = vmax.f32 %v463_v46, 0.0 }
  0xb0   : > { %566 = vst [vmem:[%s966_s29 + $0x88] sm:$0xff] %v534_v47 }
  0xb1   : > { %574 = vst [vmem:[%s966_s29 + $0xc8] sm:$0xff] %v542_v48 }
  0xb2   : > { %551 = vst [vmem:[%s966_s29 + $0x10] sm:$0xff] %v519_v49 }
  0xb3   : > { %559 = vst [vmem:[%s966_s29 + $0x50] sm:$0xff] %v527_v50  ;;  %v482_v51 = vpop.f32.mrf.mxu2  ;;  %v502_v52 = vpop.f32.mrf.mxu3 }
  0xb4   : > { %v483_v53 = vadd.f32 %v958_v20, %v482_v51  ;;  %v503_v54 = vadd.f32 %v958_v20, %v502_v52  ;;  %v444_v55 = vpop.f32.mrf.mxu0  ;;  %v464_v56 = vpop.f32.mrf.mxu1 }
  0xb5   : > { %v445_v57 = vadd.f32 %v958_v20, %v444_v55  ;;  %v465_v58 = vadd.f32 %v958_v20, %v464_v56 }
  0xb6   : > { %v535_v59 = vmax.f32 %v483_v53, 0.0  ;;  %v543_v60 = vmax.f32 %v503_v54, 0.0 }
  0xb7   : > { %v520_v61 = vmax.f32 %v445_v57, 0.0  ;;  %v528_v62 = vmax.f32 %v465_v58, 0.0 }
  0xb8   : > { %567 = vst [vmem:[%s966_s29 + $0x90] sm:$0xff] %v535_v59 }
  0xb9   : > { %575 = vst [vmem:[%s966_s29 + $0xd0] sm:$0xff] %v543_v60 }
  0xba   : > { %552 = vst [vmem:[%s966_s29 + $0x18] sm:$0xff] %v520_v61 }
  0xbb   : > { %560 = vst [vmem:[%s966_s29 + $0x58] sm:$0xff] %v528_v62  ;;  %v484_v63 = vpop.f32.mrf.mxu2  ;;  %v504_v0 = vpop.f32.mrf.mxu3 }
  0xbc   : > { %v485_v1 = vadd.f32 %v958_v20, %v484_v63  ;;  %v505_v2 = vadd.f32 %v958_v20, %v504_v0  ;;  %v447_v3 = vpop.f32.mrf.mxu0  ;;  %v467_v4 = vpop.f32.mrf.mxu1 }
  0xbd   : > { %v448_v5 = vadd.f32 %v958_v20, %v447_v3  ;;  %v468_v6 = vadd.f32 %v958_v20, %v467_v4 }
  0xbe   : > { %v536_v7 = vmax.f32 %v485_v1, 0.0  ;;  %v544_v8 = vmax.f32 %v505_v2, 0.0 }
  0xbf   : > { %v521_v9 = vmax.f32 %v448_v5, 0.0  ;;  %v529_v10 = vmax.f32 %v468_v6, 0.0 }
  0xc0   : > { %568 = vst [vmem:[%s966_s29 + $0x98] sm:$0xff] %v536_v7 }
  0xc1   : > { %576 = vst [vmem:[%s966_s29 + $0xd8] sm:$0xff] %v544_v8 }
  0xc2   : > { %553 = vst [vmem:[%s966_s29 + $0x20] sm:$0xff] %v521_v9 }
  0xc3   : > { %561 = vst [vmem:[%s966_s29 + $0x60] sm:$0xff] %v529_v10  ;;  %v487_v11 = vpop.f32.mrf.mxu2  ;;  %v507_v12 = vpop.f32.mrf.mxu3 }
  0xc4   : > { %v488_v13 = vadd.f32 %v958_v20, %v487_v11  ;;  %v508_v14 = vadd.f32 %v958_v20, %v507_v12  ;;  %v449_v15 = vpop.f32.mrf.mxu0  ;;  %v469_v16 = vpop.f32.mrf.mxu1 }
  0xc5   : > { %v450_v17 = vadd.f32 %v958_v20, %v449_v15  ;;  %v470_v18 = vadd.f32 %v958_v20, %v469_v16 }
  0xc6   : > { %v537_v19 = vmax.f32 %v488_v13, 0.0  ;;  %v545_v21 = vmax.f32 %v508_v14, 0.0 }
  0xc7   : > { %v522_v22 = vmax.f32 %v450_v17, 0.0  ;;  %v530_v23 = vmax.f32 %v470_v18, 0.0 }
  0xc8   : > { %569 = vst [vmem:[%s966_s29 + $0xa0] sm:$0xff] %v537_v19 }
  0xc9   : > { %577 = vst [vmem:[%s966_s29 + $0xe0] sm:$0xff] %v545_v21 }
  0xca   : > { %554 = vst [vmem:[%s966_s29 + $0x28] sm:$0xff] %v522_v22 }
  0xcb   : > { %562 = vst [vmem:[%s966_s29 + $0x68] sm:$0xff] %v530_v23  ;;  %v489_v24 = vpop.f32.mrf.mxu2  ;;  %v509_v25 = vpop.f32.mrf.mxu3 }
  0xcc   : > { %v490_v26 = vadd.f32 %v958_v20, %v489_v24  ;;  %v510_v27 = vadd.f32 %v958_v20, %v509_v25  ;;  %v452_v28 = vpop.f32.mrf.mxu0  ;;  %v472_v29 = vpop.f32.mrf.mxu1 }
  0xcd   : > { %v453_v30 = vadd.f32 %v958_v20, %v452_v28  ;;  %v473_v31 = vadd.f32 %v958_v20, %v472_v29 }
  0xce   : > { %v538_v32 = vmax.f32 %v490_v26, 0.0  ;;  %v546_v33 = vmax.f32 %v510_v27, 0.0 }
  0xcf   : > { %v523_v34 = vmax.f32 %v453_v30, 0.0  ;;  %v531_v35 = vmax.f32 %v473_v31, 0.0 }
  0xd0   : > { %570 = vst [vmem:[%s966_s29 + $0xa8] sm:$0xff] %v538_v32 }
  0xd1   : > { %578 = vst [vmem:[%s966_s29 + $0xe8] sm:$0xff] %v546_v33 }
  0xd2   : > { %555 = vst [vmem:[%s966_s29 + $0x30] sm:$0xff] %v523_v34 }
  0xd3   : > { %563 = vst [vmem:[%s966_s29 + $0x70] sm:$0xff] %v531_v35  ;;  %v492_v36 = vpop.f32.mrf.mxu2  ;;  %v512_v37 = vpop.f32.mrf.mxu3 }
  0xd4   : > { %v493_v38 = vadd.f32 %v958_v20, %v492_v36  ;;  %v513_v39 = vadd.f32 %v958_v20, %v512_v37  ;;  %v454_v40 = vpop.f32.mrf.mxu0  ;;  %v474_v41 = vpop.f32.mrf.mxu1 }
  0xd5   : > { %v455_v42 = vadd.f32 %v958_v20, %v454_v40  ;;  %v475_v43 = vadd.f32 %v958_v20, %v474_v41 }
  0xd6   : > { %v539_v44 = vmax.f32 %v493_v38, 0.0  ;;  %v547_v45 = vmax.f32 %v513_v39, 0.0 }
  0xd7   : > { %v524_v46 = vmax.f32 %v455_v42, 0.0  ;;  %v532_v47 = vmax.f32 %v475_v43, 0.0 }
  0xd8   : > { %571 = vst [vmem:[%s966_s29 + $0xb0] sm:$0xff] %v539_v44 }
  0xd9   : > { %579 = vst [vmem:[%s966_s29 + $0xf0] sm:$0xff] %v547_v45 }
  0xda   : > { %556 = vst [vmem:[%s966_s29 + $0x38] sm:$0xff] %v524_v46 }
  0xdb   : > { %564 = vst [vmem:[%s966_s29 + $0x78] sm:$0xff] %v532_v47  ;;  %v494_v48 = vpop.f32.mrf.mxu2  ;;  %v514_v49 = vpop.f32.mrf.mxu3 }
  0xdc   : > { %v495_v50 = vadd.f32 %v958_v20, %v494_v48  ;;  %v515_v51 = vadd.f32 %v958_v20, %v514_v49 }
  0xde   : > { %v540_v52 = vmax.f32 %v495_v50, 0.0  ;;  %v548_v53 = vmax.f32 %v515_v51, 0.0 }
  0xe0   : > { %572 = vst [vmem:[%s966_s29 + $0xb8] sm:$0xff] %v540_v52 }
  0xe1   : > { %580 = vst [vmem:[%s966_s29 + $0xf8] sm:$0xff] %v548_v53 }
  0xe2 PF: > { %s13_s14 = sadd.s32 1, %s871_s14   ;;  %s1043_s12 = smov %s867_s13 }
  0xe3   : > { %p10_p5 = scmp.ge.s32.totalorder %s13_s14, 4   ;;  %s1044_s13 = smov %s1046_s15 }
  0xe5   :  { %12 = sbr.rel (!%p10_p5) target bundleno = 2 (0x2), region = 65 }

</bundles_post_ra>
